<compile_context>
chip_gen: v5e
topology: v5e:2x2
jax: 0.10.0
libtpu: 0.0.40
codegen_flags: <defaults>
</compile_context>

<pallas_src>
import functools
import math

import jax
import jax.numpy as jnp
from jax.experimental import pallas as pl
from jax.experimental.pallas import tpu as pltpu


def _mha_kernel(qx_ref, kx_ref, vx_ref, bias_ref, qsel_ref, vsel_ref,
                wq_ref, bq_ref, wk_ref, bk_ref, wv_ref, bv_ref,
                wo_ref, bo_ref, o_ref, *, num_heads, n_q):
    """Fused MHA forward; whole (batch, head) problem in one invocation.

    qx/kx/vx are the flattened inputs tiled H times along rows, so the row
    index is (h, b, s).  qsel/vsel zero the off-head columns of the projected
    Q/V per row block (qsel also carries 1/sqrt(d_k)).  bias_ref encodes the
    (head, batch) block-diagonal structure plus the user mask.
    """
    f32 = jnp.float32
    mm = wq_ref.dtype            # MXU operand dtype (bf16 when matmul_dtype set)

    # Projections: one MXU pass each, f32 accumulation, f32 bias add.
    q = jnp.dot(qx_ref[...], wq_ref[...], preferred_element_type=f32) + bq_ref[...]
    k = jnp.dot(kx_ref[...], wk_ref[...], preferred_element_type=f32) + bk_ref[...]
    v = jnp.dot(vx_ref[...], wv_ref[...], preferred_element_type=f32) + bv_ref[...]

    # Head selection per row block (single VPU multiply, no lane slicing).
    q = q * qsel_ref[...]        # also applies 1/sqrt(d_k)
    v = v * vsel_ref[...]

    # ONE score matmul for all (head, batch) blocks: (H*B*Sq, H*B*Skv).
    s = jax.lax.dot_general(q.astype(mm), k.astype(mm),
                            dimension_numbers=(((1,), (1,)), ((), ())),
                            preferred_element_type=f32)

    # torch masked_fill semantics: replace the score wherever bias != 0
    # (-1e9 for user-masked positions, -1e30 for structural off-block).
    bias = bias_ref[...]
    s = jnp.where(bias == 0.0, s, bias)

    # ONE row softmax in f32 (exact divide).
    s = s - jnp.max(s, axis=-1, keepdims=True)
    e = jnp.exp(s)
    p = e / jnp.sum(e, axis=-1, keepdims=True)

    # ONE p @ v matmul; row block h holds head h's output in head-h columns
    # (everything else is exactly zero).
    o_st = jnp.dot(p.astype(mm), v.astype(mm), preferred_element_type=f32)

    # Head merge = sum of the H sublane-aligned row blocks (no transpose).
    attn = o_st[0:n_q, :]
    for h in range(1, num_heads):
        attn = attn + o_st[h * n_q:(h + 1) * n_q, :]

    # ONE W_o matmul and ONE lane-dense store of the whole (B*Sq, D) output.
    out = jnp.dot(attn.astype(mm), wo_ref[...], preferred_element_type=f32) + bo_ref[...]
    o_ref[...] = out.astype(o_ref.dtype)


def multi_head_attention(Q, K, V, params, *, num_heads, mask=None,
                         matmul_dtype=None):
    B, Sq, D = Q.shape
    Skv = K.shape[1]
    assert D % num_heads == 0
    H = num_heads
    d_k = D // H
    n_q, n_kv = B * Sq, B * Skv
    out_dtype = Q.dtype
    f32 = jnp.float32
    scale = 1.0 / math.sqrt(d_k)

    # ---- layout plumbing (free in XLA; keeps relayouts out of the kernel) ----
    # Flatten to (B*S, D) and tile H times along rows -> row index (h, b, s).
    qx = jnp.tile(Q.reshape(n_q, D), (H, 1))
    kx = jnp.tile(K.reshape(n_kv, D), (H, 1))
    vx = jnp.tile(V.reshape(n_kv, D), (H, 1))

    # Head-selection masks: row block h keeps only head-h columns of D.
    col_head = jnp.arange(D) // d_k                                   # (D,)
    qsel = (jnp.repeat(jnp.arange(H), n_q)[:, None] == col_head[None, :])
    qsel = qsel.astype(f32) * scale                                   # fold 1/sqrt(d_k)
    vsel = (jnp.repeat(jnp.arange(H), n_kv)[:, None] == col_head[None, :]).astype(f32)

    # Combined score bias (replace-style), built once in the wrapper:
    #   0.0   keep (same head, same batch, user mask != 0)
    #   -1e9  user-masked (exactly torch's masked_fill value)
    #   -1e30 structural off-block (different head or batch)
    if mask is None:
        keep = jnp.ones((B, Sq, Skv), bool)
    else:
        keep = jnp.broadcast_to(mask != 0, (B, Sq, Skv))
    rh = jnp.repeat(jnp.arange(H), n_q)
    rb = jnp.tile(jnp.repeat(jnp.arange(B), Sq), H)
    rs = jnp.tile(jnp.arange(Sq), H * B)
    ch = jnp.repeat(jnp.arange(H), n_kv)
    cb = jnp.tile(jnp.repeat(jnp.arange(B), Skv), H)
    cj = jnp.tile(jnp.arange(Skv), H * B)
    same_block = (rh[:, None] == ch[None, :]) & (rb[:, None] == cb[None, :])
    keep_rc = keep[rb[:, None], rs[:, None], cj[None, :]]
    bias = jnp.where(same_block,
                     jnp.where(keep_rc, 0.0, -1e9),
                     -1e30).astype(f32)

    wq, wk, wv, wo = params["wq"], params["wk"], params["wv"], params["wo"]
    if matmul_dtype is not None:
        # bf16 MXU operands on v5e/v6e/v7x (halves weight/activation bytes,
        # ~2x MXU rate); softmax, masking and all accumulations stay f32.
        qx, kx, vx = (a.astype(matmul_dtype) for a in (qx, kx, vx))
        wq, wk, wv, wo = (w.astype(matmul_dtype) for w in (wq, wk, wv, wo))

    kernel = functools.partial(_mha_kernel, num_heads=H, n_q=n_q)
    vmem = pl.BlockSpec(memory_space=pltpu.MemorySpace.VMEM)

    # Whole problem fits easily in VMEM at these shapes -> no grid; a flash
    # style grid (parallel over B/H on v7x's two TensorCores) is only worth
    # it at much larger S (see TODO above).
    out_flat = pl.pallas_call(
        kernel,
        out_shape=jax.ShapeDtypeStruct((n_q, D), out_dtype),
        in_specs=[vmem] * 14,
        out_specs=vmem,
    )(qx, kx, vx, bias, qsel, vsel,
      wq, params["bq"], wk, params["bk"], wv, params["bv"],
      wo, params["bo"])
    return out_flat.reshape(B, Sq, D)


def _reference(Q, K, V, mask, p, num_heads):
    """Pure-JAX reference mirroring the PyTorch MultiHeadAttention.forward."""
    B, Sq, D = Q.shape
    d_k = D // num_heads

    def lin(a, w, b):
        return a @ w + b[0]

    q = lin(Q, p["wq"], p["bq"]).reshape(B, Sq, num_heads, d_k).transpose(0, 2, 1, 3)
    k = lin(K, p["wk"], p["bk"]).reshape(B, -1, num_heads, d_k).transpose(0, 2, 1, 3)
    v = lin(V, p["wv"], p["bv"]).reshape(B, -1, num_heads, d_k).transpose(0, 2, 1, 3)
    s = jnp.einsum("bhqd,bhkd->bhqk", q, k) / math.sqrt(d_k)
    if mask is not None:
        s = jnp.where(mask[:, None, :, :] == 0, -1e9, s)
    pr = jax.nn.softmax(s, axis=-1)
    a = jnp.einsum("bhqk,bhkd->bhqd", pr, v).transpose(0, 2, 1, 3).reshape(B, Sq, D)
    return lin(a, p["wo"], p["bo"])


if __name__ == "__main__":
    B, S, D, H = 2, 8, 32, 4
    key = jax.random.PRNGKey(0)
    ks = jax.random.split(key, 11)

    def w(k, shape, scale=0.1):
        return (scale * jax.random.normal(k, shape)).astype(jnp.float32)

    params = {
        "wq": w(ks[0], (D, D)), "bq": w(ks[1], (1, D)),
        "wk": w(ks[2], (D, D)), "bk": w(ks[3], (1, D)),
        "wv": w(ks[4], (D, D)), "bv": w(ks[5], (1, D)),
        "wo": w(ks[6], (D, D)), "bo": w(ks[7], (1, D)),
    }

    Q = jax.random.normal(ks[8], (B, S, D), jnp.float32)
    K = jax.random.normal(ks[9], (B, S, D), jnp.float32)
    V = jax.random.normal(ks[10], (B, S, D), jnp.float32)
    # causal mask with zeros to exercise the masked_fill path
    mask = jnp.tril(jnp.ones((S, S), jnp.float32))[None].repeat(B, axis=0)

    # f32 path (exact-divide softmax -> tight tolerance vs the reference)
    out = multi_head_attention(Q, K, V, params, num_heads=H, mask=mask)
    out = jax.block_until_ready(out)
    ref = _reference(Q, K, V, mask, params, H)
    assert out.shape == (B, S, D)
    err = float(jnp.max(jnp.abs(out - ref)))
    assert jnp.allclose(out, ref, rtol=2e-3, atol=2e-3), f"max abs err {err}"

    # mask=None path
    out_nm = jax.block_until_ready(
        multi_head_attention(Q, K, V, params, num_heads=H, mask=None))
    ref_nm = _reference(Q, K, V, None, params, H)
    assert jnp.allclose(out_nm, ref_nm, rtol=2e-3, atol=2e-3)

    # bf16 MXU-operand path (v5e/v6e/v7x); looser tolerance for bf16 rounding
    out_bf = jax.block_until_ready(
        multi_head_attention(Q, K, V, params, num_heads=H, mask=mask,
                             matmul_dtype=jnp.bfloat16))
    assert jnp.allclose(out_bf, ref, rtol=5e-2, atol=5e-2)

    print("KERNEL_OK")
</pallas_src>

<mosaic_0001>
module attributes {stable_mosaic.version = 11 : i64} {
  func.func @_mha_kernel(%arg0: memref<64x32xf32, #tpu.memory_space<vmem>>, %arg1: memref<64x32xf32, #tpu.memory_space<vmem>>, %arg2: memref<64x32xf32, #tpu.memory_space<vmem>>, %arg3: memref<64x64xf32, #tpu.memory_space<vmem>>, %arg4: memref<64x32xf32, #tpu.memory_space<vmem>>, %arg5: memref<64x32xf32, #tpu.memory_space<vmem>>, %arg6: memref<32x32xf32, #tpu.memory_space<vmem>>, %arg7: memref<1x32xf32, #tpu.memory_space<vmem>>, %arg8: memref<32x32xf32, #tpu.memory_space<vmem>>, %arg9: memref<1x32xf32, #tpu.memory_space<vmem>>, %arg10: memref<32x32xf32, #tpu.memory_space<vmem>>, %arg11: memref<1x32xf32, #tpu.memory_space<vmem>>, %arg12: memref<32x32xf32, #tpu.memory_space<vmem>>, %arg13: memref<1x32xf32, #tpu.memory_space<vmem>>, %arg14: memref<16x32xf32, #tpu.memory_space<vmem>>) attributes {dimension_semantics = [], scalar_prefetch = 0 : i64, scratch_operands = 0 : i64, tpu.core_type = #tpu.core_type<tc>} {
    %c0 = arith.constant 0 : index
    %c0_0 = arith.constant 0 : index
    %0 = vector.load %arg0[%c0, %c0_0] : memref<64x32xf32, #tpu.memory_space<vmem>>, vector<64x32xf32>
    %c0_1 = arith.constant 0 : index
    %c0_2 = arith.constant 0 : index
    %1 = vector.load %arg6[%c0_1, %c0_2] : memref<32x32xf32, #tpu.memory_space<vmem>>, vector<32x32xf32>
    %cst = arith.constant dense<0.000000e+00> : vector<64x32xf32>
    %2 = tpu.matmul %0, %1, %cst {dimension_numbers = #tpu.dot_dimension_numbers<[1], [0], [0], [1], [0, 0, 1, 1], [], []>} : vector<64x32xf32>, vector<32x32xf32>, vector<64x32xf32> -> vector<64x32xf32>
    %c0_3 = arith.constant 0 : index
    %c0_4 = arith.constant 0 : index
    %3 = vector.load %arg7[%c0_3, %c0_4] : memref<1x32xf32, #tpu.memory_space<vmem>>, vector<1x32xf32>
    %4 = vector.broadcast %3 : vector<1x32xf32> to vector<64x32xf32>
    %5 = arith.addf %2, %4 : vector<64x32xf32>
    %c0_5 = arith.constant 0 : index
    %c0_6 = arith.constant 0 : index
    %6 = vector.load %arg1[%c0_5, %c0_6] : memref<64x32xf32, #tpu.memory_space<vmem>>, vector<64x32xf32>
    %c0_7 = arith.constant 0 : index
    %c0_8 = arith.constant 0 : index
    %7 = vector.load %arg8[%c0_7, %c0_8] : memref<32x32xf32, #tpu.memory_space<vmem>>, vector<32x32xf32>
    %cst_9 = arith.constant dense<0.000000e+00> : vector<64x32xf32>
    %8 = tpu.matmul %6, %7, %cst_9 {dimension_numbers = #tpu.dot_dimension_numbers<[1], [0], [0], [1], [0, 0, 1, 1], [], []>} : vector<64x32xf32>, vector<32x32xf32>, vector<64x32xf32> -> vector<64x32xf32>
    %c0_10 = arith.constant 0 : index
    %c0_11 = arith.constant 0 : index
    %9 = vector.load %arg9[%c0_10, %c0_11] : memref<1x32xf32, #tpu.memory_space<vmem>>, vector<1x32xf32>
    %10 = vector.broadcast %9 : vector<1x32xf32> to vector<64x32xf32>
    %11 = arith.addf %8, %10 : vector<64x32xf32>
    %c0_12 = arith.constant 0 : index
    %c0_13 = arith.constant 0 : index
    %12 = vector.load %arg2[%c0_12, %c0_13] : memref<64x32xf32, #tpu.memory_space<vmem>>, vector<64x32xf32>
    %c0_14 = arith.constant 0 : index
    %c0_15 = arith.constant 0 : index
    %13 = vector.load %arg10[%c0_14, %c0_15] : memref<32x32xf32, #tpu.memory_space<vmem>>, vector<32x32xf32>
    %cst_16 = arith.constant dense<0.000000e+00> : vector<64x32xf32>
    %14 = tpu.matmul %12, %13, %cst_16 {dimension_numbers = #tpu.dot_dimension_numbers<[1], [0], [0], [1], [0, 0, 1, 1], [], []>} : vector<64x32xf32>, vector<32x32xf32>, vector<64x32xf32> -> vector<64x32xf32>
    %c0_17 = arith.constant 0 : index
    %c0_18 = arith.constant 0 : index
    %15 = vector.load %arg11[%c0_17, %c0_18] : memref<1x32xf32, #tpu.memory_space<vmem>>, vector<1x32xf32>
    %16 = vector.broadcast %15 : vector<1x32xf32> to vector<64x32xf32>
    %17 = arith.addf %14, %16 : vector<64x32xf32>
    %c0_19 = arith.constant 0 : index
    %c0_20 = arith.constant 0 : index
    %18 = vector.load %arg4[%c0_19, %c0_20] : memref<64x32xf32, #tpu.memory_space<vmem>>, vector<64x32xf32>
    %19 = arith.mulf %5, %18 : vector<64x32xf32>
    %c0_21 = arith.constant 0 : index
    %c0_22 = arith.constant 0 : index
    %20 = vector.load %arg5[%c0_21, %c0_22] : memref<64x32xf32, #tpu.memory_space<vmem>>, vector<64x32xf32>
    %21 = arith.mulf %17, %20 : vector<64x32xf32>
    %cst_23 = arith.constant dense<0.000000e+00> : vector<64x64xf32>
    %22 = tpu.matmul %19, %11, %cst_23 {dimension_numbers = #tpu.dot_dimension_numbers<[1], [1], [0], [0], [0, 0, 1, 0], [], []>} : vector<64x32xf32>, vector<64x32xf32>, vector<64x64xf32> -> vector<64x64xf32>
    %c0_24 = arith.constant 0 : index
    %c0_25 = arith.constant 0 : index
    %23 = vector.load %arg3[%c0_24, %c0_25] : memref<64x64xf32, #tpu.memory_space<vmem>>, vector<64x64xf32>
    %cst_26 = arith.constant 0.000000e+00 : f32
    %24 = vector.broadcast %cst_26 : f32 to vector<64x64xf32>
    %25 = arith.cmpf oeq, %23, %24 : vector<64x64xf32>
    %26 = arith.select %25, %22, %23 : vector<64x64xi1>, vector<64x64xf32>
    %cst_27 = arith.constant dense<0xFF800000> : vector<64xf32>
    %27 = vector.multi_reduction <maximumf>, %26, %cst_27 [1] : vector<64x64xf32> to vector<64xf32>
    %28 = vector.shape_cast %27 : vector<64xf32> to vector<64x1xf32>
    %29 = vector.broadcast %28 : vector<64x1xf32> to vector<64x64xf32>
    %30 = arith.subf %26, %29 : vector<64x64xf32>
    %31 = math.exp %30 : vector<64x64xf32>
    %cst_28 = arith.constant dense<0.000000e+00> : vector<64xf32>
    %32 = vector.multi_reduction <add>, %31, %cst_28 [1] : vector<64x64xf32> to vector<64xf32>
    %33 = vector.shape_cast %32 : vector<64xf32> to vector<64x1xf32>
    %34 = vector.broadcast %33 : vector<64x1xf32> to vector<64x64xf32>
    %35 = arith.divf %31, %34 : vector<64x64xf32>
    %cst_29 = arith.constant dense<0.000000e+00> : vector<64x32xf32>
    %36 = tpu.matmul %35, %21, %cst_29 {dimension_numbers = #tpu.dot_dimension_numbers<[1], [0], [0], [1], [0, 0, 1, 1], [], []>} : vector<64x64xf32>, vector<64x32xf32>, vector<64x32xf32> -> vector<64x32xf32>
    %37 = vector.extract_strided_slice %36 {offsets = [0, 0], sizes = [16, 32], strides = [1, 1]} : vector<64x32xf32> to vector<16x32xf32>
    %38 = vector.extract_strided_slice %36 {offsets = [16, 0], sizes = [16, 32], strides = [1, 1]} : vector<64x32xf32> to vector<16x32xf32>
    %39 = arith.addf %37, %38 : vector<16x32xf32>
    %40 = vector.extract_strided_slice %36 {offsets = [32, 0], sizes = [16, 32], strides = [1, 1]} : vector<64x32xf32> to vector<16x32xf32>
    %41 = arith.addf %39, %40 : vector<16x32xf32>
    %42 = vector.extract_strided_slice %36 {offsets = [48, 0], sizes = [16, 32], strides = [1, 1]} : vector<64x32xf32> to vector<16x32xf32>
    %43 = arith.addf %41, %42 : vector<16x32xf32>
    %c0_30 = arith.constant 0 : index
    %c0_31 = arith.constant 0 : index
    %44 = vector.load %arg12[%c0_30, %c0_31] : memref<32x32xf32, #tpu.memory_space<vmem>>, vector<32x32xf32>
    %cst_32 = arith.constant dense<0.000000e+00> : vector<16x32xf32>
    %45 = tpu.matmul %43, %44, %cst_32 {dimension_numbers = #tpu.dot_dimension_numbers<[1], [0], [0], [1], [0, 0, 1, 1], [], []>} : vector<16x32xf32>, vector<32x32xf32>, vector<16x32xf32> -> vector<16x32xf32>
    %c0_33 = arith.constant 0 : index
    %c0_34 = arith.constant 0 : index
    %46 = vector.load %arg13[%c0_33, %c0_34] : memref<1x32xf32, #tpu.memory_space<vmem>>, vector<1x32xf32>
    %47 = vector.broadcast %46 : vector<1x32xf32> to vector<16x32xf32>
    %48 = arith.addf %45, %47 : vector<16x32xf32>
    %c0_35 = arith.constant 0 : index
    %c0_36 = arith.constant 0 : index
    %49 = vector.load %arg14[%c0_35, %c0_36] : memref<16x32xf32, #tpu.memory_space<vmem>>, vector<16x32xf32>
    tpu.vector_store %arg14[%c0_35, %c0_36], %48 {strides = array<i32>} : memref<16x32xf32, #tpu.memory_space<vmem>>, vector<16x32xf32>,
    return
  }
}

</mosaic_0001>

<bundles_post_ra>
// kernel: tpu_custom_call.1
= control target key start
LH: loop header
LB: loop body
LE: loop exit
PB: predicated region body
PF: predicated region fallthrough
CT: control target
= control target key end

     0   :  { %s1286_s0 = inlined_call_operand.vmem [shape: f32[64,32], index: 0, kind: input, shape index: {}]   ;;  %s1287_s1 = inlined_call_operand.vmem [shape: f32[64,32], index: 1, kind: input, shape index: {}]   ;;  %s1288_s2 = inlined_call_operand.vmem [shape: f32[64,32], index: 2, kind: input, shape index: {}]   ;;  %s1289_s3 = inlined_call_operand.vmem [shape: f32[64,64], index: 3, kind: input, shape index: {}]   ;;  %s1290_s4 = inlined_call_operand.vmem [shape: f32[64,32], index: 4, kind: input, shape index: {}]   ;;  %s1291_s5 = inlined_call_operand.vmem [shape: f32[64,32], index: 5, kind: input, shape index: {}]   ;;  %s1292_s6 = inlined_call_operand.vmem [shape: f32[32,32], index: 6, kind: input, shape index: {}]   ;;  %s1293_s7 = inlined_call_operand.vmem [shape: f32[1,32], index: 7, kind: input, shape index: {}]   ;;  %s1294_s8 = inlined_call_operand.vmem [shape: f32[32,32], index: 8, kind: input, shape index: {}]   ;;  %s1295_s9 = inlined_call_operand.vmem [shape: f32[1,32], index: 9, kind: input, shape index: {}]   ;;  %s1296_s10 = inlined_call_operand.vmem [shape: f32[32,32], index: 10, kind: input, shape index: {}]   ;;  %s1297_s11 = inlined_call_operand.vmem [shape: f32[1,32], index: 11, kind: input, shape index: {}]   ;;  %s1298_s12 = inlined_call_operand.vmem [shape: f32[32,32], index: 12, kind: input, shape index: {}]   ;;  %s1299_s13 = inlined_call_operand.vmem [shape: f32[1,32], index: 13, kind: input, shape index: {}]   ;;  %s1300_s14 = inlined_call_operand.hbm [shape: f32[16,32], index: 14, kind: output, shape index: {}]  }
   0x1   :  { %v141_v0 = vld [vmem:[%s1294_s8 + $0x18] sm:$0xff]  ;;  %v140_v1 = vld [vmem:[%s1294_s8 + $0x10] sm:$0xff]  ;;  %v139_v2 = vld [vmem:[%s1294_s8 + $0x8] sm:$0xff] }
   0x2   :  { %182 = vmatpush.msra.mxu1 %v141_v0  ;;  %v138_v3 = vld [vmem:[%s1294_s8] sm:$0xff] }
   0x4   :  { %183 = vmatpush.msra.mxu1 %v140_v1 }
   0x5   :  { %19 = vsyncpa [#allocation3], 0  ;;  %vm64_vm0 = vcmask 261120   ;;  %v130_v4 = vld [vmem:[%s1287_s1] sm:$0xff]  ;;  %v131_v5 = vld [vmem:[%s1287_s1 + $0x8] sm:$0xff]  ;;  %vm437_vm2 = vcmask 523264  }
   0x6   :  { %184 = vmatpush.msra.mxu1 %v139_v2  ;;  %v132_v6 = vld [vmem:[%s1287_s1 + $0x10] sm:$0xff]  ;;  %v133_v7 = vld [vmem:[%s1287_s1 + $0x18] sm:$0xff]  ;;  %v57_v10 = vld [vmem:[%s1292_s6 + $0x8] sm:$0xff]  ;;  %s877_s15 = smov [#allocation2]   ;;  %s746_s18 = sshll.u32 %s1300_s14, 4  ;;  %s747_s18 = int_to_ptr.hbm [resolvable:$true] %s746_s18 }
   0x7   :  { %v59_v8 = vld [vmem:[%s1292_s6 + $0x18] sm:$0xff]  ;;  %v58_v9 = vld [vmem:[%s1292_s6 + $0x10] sm:$0xff]  ;;  %v56_v11 = vld [vmem:[%s1292_s6] sm:$0xff]  ;;  %s878_s19 = smov 128   ;;  %s879_s20 = smov 8  }
   0x8   :  { %185 = vmatpush.msra.mxu1 %v138_v3  ;;  %101 = vmatpush.msra.mxu0 %v59_v8  ;;  %v134_v12 = vld [vmem:[%s1287_s1 + $0x20] sm:$0xff]  ;;  %v135_v15 = vld [vmem:[%s1287_s1 + $0x28] sm:$0xff]  ;;  %v136_v18 = vld [vmem:[%s1287_s1 + $0x30] sm:$0xff] }
   0x9   :  { %766 = vmatmul.msk.f32.vlgmr.msra.gmra.mxu1 %vm64_vm0, %v130_v4  ;;  %808 = vmatpush.msra.mxu2 %v59_v8  ;;  %v48_v13 = vld [vmem:[%s1286_s0] sm:$0xff]  ;;  %v49_v16 = vld [vmem:[%s1286_s0 + $0x8] sm:$0xff]  ;;  %v50_v19 = vld [vmem:[%s1286_s0 + $0x10] sm:$0xff] }
   0xa   :  { %102 = vmatpush.msra.mxu0 %v58_v9  ;;  %v52_v14 = vld [vmem:[%s1286_s0 + $0x20] sm:$0xff]  ;;  %v53_v17 = vld [vmem:[%s1286_s0 + $0x28] sm:$0xff]  ;;  %v137_v20 = vld [vmem:[%s1287_s1 + $0x38] sm:$0xff] }
   0xb   :  { %809 = vmatpush.msra.mxu2 %v58_v9  ;;  %v51_v21 = vld [vmem:[%s1286_s0 + $0x18] sm:$0xff]  ;;  %v54_v22 = vld [vmem:[%s1286_s0 + $0x30] sm:$0xff]  ;;  %v815_v31 = vld [vmem:[%s1295_s9] ss:$0 sm:$0xff] }
   0xc   :  { %103 = vmatpush.msra.mxu0 %v57_v10  ;;  %v55_v23 = vld [vmem:[%s1286_s0 + $0x38] sm:$0xff]  ;;  %v816_v40 = vld [vmem:[%s1293_s7] ss:$0 sm:$0xff]  ;;  %v293_v48 = vld [vmem:[%s1290_s4 + $0x8] sm:$0xff] }
   0xd   :  { %810 = vmatpush.msra.mxu2 %v57_v10  ;;  %v292_v43 = vld [vmem:[%s1290_s4] sm:$0xff]  ;;  %v294_v52 = vld [vmem:[%s1290_s4 + $0x10] sm:$0xff]  ;;  %v295_v57 = vld [vmem:[%s1290_s4 + $0x18] sm:$0xff] }
   0xe   :  { %104 = vmatpush.msra.mxu0 %v56_v11  ;;  %v222_v60 = vld [vmem:[%s1296_s10 + $0x18] sm:$0xff]  ;;  %v221_v61 = vld [vmem:[%s1296_s10 + $0x10] sm:$0xff]  ;;  %v296_v62 = vld [vmem:[%s1290_s4 + $0x20] sm:$0xff] }
   0xf   :  { %811 = vmatpush.msra.mxu2 %v56_v11  ;;  %758 = vmatmul.msk.f32.vlgmr.msra.gmra.mxu0 %vm64_vm0, %v48_v13  ;;  %v220_v0 = vld [vmem:[%s1296_s10 + $0x8] sm:$0xff]  ;;  %v219_v2 = vld [vmem:[%s1296_s10] sm:$0xff]  ;;  %v298_v10 = vld [vmem:[%s1290_s4 + $0x30] sm:$0xff] }
  0x10   :  { %762 = vmatmul.msk.f32.vlgmr.msra.gmra.mxu2 %vm64_vm0, %v52_v14  ;;  %v211_v3 = vld [vmem:[%s1288_s2] sm:$0xff]  ;;  %v212_v8 = vld [vmem:[%s1288_s2 + $0x8] sm:$0xff]  ;;  %v213_v13 = vld [vmem:[%s1288_s2 + $0x10] sm:$0xff] }
  0x11   :  { %767 = vmatmul.msk.f32.gmra.mxu1 %vm64_vm0, %v131_v5  ;;  %263 = vmatpush.msrb.mxu2 %v222_v60  ;;  %v297_v5 = vld [vmem:[%s1290_s4 + $0x28] sm:$0xff] }
  0x13   :  { %264 = vmatpush.msrb.mxu2 %v221_v61 }
  0x15   :  { %265 = vmatpush.msrb.mxu2 %v220_v0 }
  0x17   :  { %759 = vmatmul.msk.f32.gmra.mxu0 %vm64_vm0, %v49_v16  ;;  %266 = vmatpush.msrb.mxu2 %v219_v2  ;;  %v817_v2 = vld [vmem:[%s1297_s11] ss:$0 sm:$0xff] }
  0x18   :  { %763 = vmatmul.msk.f32.gmra.mxu2 %vm64_vm0, %v53_v17  ;;  %v214_v17 = vld [vmem:[%s1288_s2 + $0x18] sm:$0xff] }
  0x19   :  { %768 = vmatmul.msk.f32.gmra.mxu1 %vm64_vm0, %v132_v6 }
  0x1f   :  { %760 = vmatmul.msk.f32.gmra.mxu0 %vm64_vm0, %v50_v19  ;;  %v216_v19 = vld [vmem:[%s1288_s2 + $0x28] sm:$0xff] }
  0x20   :  { %764 = vmatmul.msk.f32.gmra.mxu2 %vm64_vm0, %v54_v22  ;;  %v218_v22 = vld [vmem:[%s1288_s2 + $0x38] sm:$0xff] }
  0x21   :  { %769 = vmatmul.msk.f32.gmra.mxu1 %vm64_vm0, %v133_v7 }
  0x27   :  { %761 = vmatmul.msk.f32.gmra.mxu0 %vm64_vm0, %v51_v21  ;;  %v413_v21 = vld [vmem:[%s1289_s3] sm:$0xff] }
  0x28   :  { %765 = vmatmul.msk.f32.gmra.mxu2 %vm64_vm0, %v55_v23  ;;  %vm421_vm1 = vcmp.eq.f32.partialorder %v413_v21, 0.0 }
  0x29   :  { %770 = vmatmul.msk.f32.gmra.mxu1 %vm64_vm0, %v134_v12 }
  0x30   :  { %774 = vmatmul.msk.f32.vlgmr.msrb.gmra.mxu2 %vm64_vm0, %v211_v3 }
  0x31   :  { %771 = vmatmul.msk.f32.gmra.mxu1 %vm64_vm0, %v135_v15  ;;  %v299_v15 = vld [vmem:[%s1290_s4 + $0x38] sm:$0xff] }
  0x38   :  { %775 = vmatmul.msk.f32.gmra.mxu2 %vm64_vm0, %v212_v8  ;;  %v315_v8 = vld [vmem:[%s1291_s5 + $0x38] sm:$0xff] }
  0x39   :  { %772 = vmatmul.msk.f32.gmra.mxu1 %vm64_vm0, %v136_v18  ;;  %v215_v18 = vld [vmem:[%s1288_s2 + $0x20] sm:$0xff] }
  0x40   :  { %776 = vmatmul.msk.f32.gmra.mxu2 %vm64_vm0, %v213_v13 }
  0x41   :  { %773 = vmatmul.msk.f32.gmra.mxu1 %vm64_vm0, %v137_v20  ;;  %v217_v20 = vld [vmem:[%s1288_s2 + $0x30] sm:$0xff] }
  0x48   :  { %777 = vmatmul.msk.f32.gmra.mxu2 %vm64_vm0, %v214_v17 }
  0x50   :  { %778 = vmatmul.msk.f32.gmra.mxu2 %vm64_vm0, %v215_v18 }
  0x58   :  { %779 = vmatmul.msk.f32.gmra.mxu2 %vm64_vm0, %v216_v19 }
  0x60   :  { %780 = vmatmul.msk.f32.gmra.mxu2 %vm64_vm0, %v217_v20 }
  0x68   :  { %781 = vmatmul.msk.f32.gmra.mxu2 %vm64_vm0, %v218_v22  ;;  %v312_v22 = vld [vmem:[%s1291_s5 + $0x20] sm:$0xff] }
  0x86   :  { %v187_v24 = vpop.f32.mrf.mxu1 }
  0x87   :  { %v188_v45 = vadd.f32 %v815_v31, %v187_v24 }
  0x8c   :  { %v106_v38 = vpop.f32.mrf.mxu0 }
  0x8d   :  { %v107_v42 = vadd.f32 %v816_v40, %v106_v38  ;;  %v417_v38 = vld [vmem:[%s1289_s3 + $0x20] sm:$0xff] }
  0x8e   :  { %v190_v25 = vpop.f32.mrf.mxu1  ;;  %vm425_vm6 = vcmp.eq.f32.partialorder %v417_v38, 0.0 }
  0x8f   :  { %v191_v41 = vadd.f32 %v815_v31, %v190_v25  ;;  %v300_v46 = vmul.f32 %v292_v43, %v107_v42  ;;  %v418_v42 = vld [vmem:[%s1289_s3 + $0x28] sm:$0xff] }
  0x90   :  { %vm426_vm7 = vcmp.eq.f32.partialorder %v418_v42, 0.0 }
  0x93   :  { %v118_v55 = vpop.f32.mrf.mxu2 }
  0x94   :  { %v109_v44 = vpop.f32.mrf.mxu0  ;;  %v119_v59 = vadd.f32 %v816_v40, %v118_v55 }
  0x95   :  { %v110_v47 = vadd.f32 %v816_v40, %v109_v44 }
  0x96   :  { %v193_v26 = vpop.f32.mrf.mxu1  ;;  %v304_v1 = vmul.f32 %v296_v62, %v119_v59 }
  0x97   :  { %v194_v39 = vadd.f32 %v815_v31, %v193_v26  ;;  %v301_v50 = vmul.f32 %v293_v48, %v110_v47  ;;  %v414_v26 = vld [vmem:[%s1289_s3 + $0x8] sm:$0xff] }
  0x98   :  { %vm422_vm3 = vcmp.eq.f32.partialorder %v414_v26, 0.0 }
  0x9b   :  { %v121_v63 = vpop.f32.mrf.mxu2 }
  0x9c   :  { %v112_v49 = vpop.f32.mrf.mxu0  ;;  %v122_v4 = vadd.f32 %v816_v40, %v121_v63 }
  0x9d   :  { %v113_v51 = vadd.f32 %v816_v40, %v112_v49 }
  0x9e   :  { %v196_v27 = vpop.f32.mrf.mxu1  ;;  %v305_v7 = vmul.f32 %v297_v5, %v122_v4 }
  0x9f   :  { %v197_v37 = vadd.f32 %v815_v31, %v196_v27  ;;  %v302_v53 = vmul.f32 %v294_v52, %v113_v51 }
  0xa3   :  { %v124_v6 = vpop.f32.mrf.mxu2 }
  0xa4   :  { %v115_v54 = vpop.f32.mrf.mxu0  ;;  %v125_v9 = vadd.f32 %v816_v40, %v124_v6 }
  0xa5   :  { %v116_v56 = vadd.f32 %v816_v40, %v115_v54 }
  0xa6   :  { %v199_v28 = vpop.f32.mrf.mxu1  ;;  %v306_v11 = vmul.f32 %v298_v10, %v125_v9  ;;  %v314_v9 = vld [vmem:[%s1291_s5 + $0x30] sm:$0xff] }
  0xa7   :  { %v200_v36 = vadd.f32 %v815_v31, %v199_v28  ;;  %v303_v58 = vmul.f32 %v295_v57, %v116_v56 }
  0xab   :  { %v127_v12 = vpop.f32.mrf.mxu2 }
  0xac   :  { %v128_v14 = vadd.f32 %v816_v40, %v127_v12 }
  0xae   :  { %v202_v29 = vpop.f32.mrf.mxu1  ;;  %v307_v16 = vmul.f32 %v299_v15, %v128_v14 }
  0xaf   :  { %v203_v35 = vadd.f32 %v815_v31, %v202_v29 }
  0xb3   :  { %v268_v54 = vpop.f32.mrf.mxu2 }
  0xb6   :  { %v205_v30 = vpop.f32.mrf.mxu1 }
  0xb7   :  { %v206_v34 = vadd.f32 %v815_v31, %v205_v30  ;;  %v415_v30 = vld [vmem:[%s1289_s3 + $0x10] sm:$0xff] }
  0xb8   :  { %vm423_vm4 = vcmp.eq.f32.partialorder %v415_v30, 0.0 }
  0xbb   :  { %v271_v55 = vpop.f32.mrf.mxu2 }
  0xbe   :  { %v208_v32 = vpop.f32.mrf.mxu1 }
  0xbf   :  { %v209_v33 = vadd.f32 %v815_v31, %v208_v32 }
  0xc1   :  { %782 = vmatpush.xpose.msk.msra.mxu3 %vm64_vm0, %v209_v33 }
  0xc3   :  { %v274_v56 = vpop.f32.mrf.mxu2 }
  0xc5   :  { %783 = vmatpush.xpose.msk.msra.mxu3 %vm64_vm0, %v206_v34  ;;  %v416_v34 = vld [vmem:[%s1289_s3 + $0x18] sm:$0xff] }
  0xc6   :  { %vm424_vm5 = vcmp.eq.f32.partialorder %v416_v34, 0.0 }
  0xc9   :  { %784 = vmatpush.xpose.msk.msra.mxu3 %vm64_vm0, %v203_v35 }
  0xcb   :  { %v277_v57 = vpop.f32.mrf.mxu2 }
  0xcc   :  { %v278_v19 = vadd.f32 %v817_v2, %v277_v57 }
  0xcd   :  { %785 = vmatpush.xpose.msk.msra.mxu3 %vm64_vm0, %v200_v36 }
  0xd1   :  { %786 = vmatpush.xpose.msk.msra.mxu3 %vm64_vm0, %v197_v37 }
  0xd5   :  { %787 = vmatpush.xpose.msk.msra.mxu3 %vm64_vm0, %v194_v39 }
  0xd9   :  { %788 = vmatpush.xpose.msk.msra.mxu3 %vm64_vm0, %v191_v41 }
  0xdd   :  { %789 = vmatpush.xpose.msk.msra.mxu3 %vm64_vm0, %v188_v45 }
  0xe0   :  { %790 = vmatmul.msk.f32.vlgmr.msra.gmra.mxu3 %vm64_vm0, %v300_v46  ;;  %v419_v46 = vld [vmem:[%s1289_s3 + $0x30] sm:$0xff] }
  0xe1   :  { %vm427_vm8 = vcmp.eq.f32.partialorder %v419_v46, 0.0 }
  0xe8   :  { %791 = vmatmul.msk.f32.gmra.mxu3 %vm64_vm0, %v301_v50  ;;  %v420_v50 = vld [vmem:[%s1289_s3 + $0x38] sm:$0xff]  ;;  %s744_s3 = sshll.u32 %s877_s15, 4  ;;  %s745_s3 = int_to_ptr.vmem [resolvable:$true] %s744_s3 }
  0xe9   :  { %vm428_vm9 = vcmp.eq.f32.partialorder %v420_v50, 0.0 }
  0xf0   :  { %792 = vmatmul.msk.f32.gmra.mxu3 %vm64_vm0, %v302_v53 }
  0xf8   :  { %793 = vmatmul.msk.f32.gmra.mxu3 %vm64_vm0, %v303_v58  ;;  %v280_v58 = vpop.f32.mrf.mxu2 }
  0xf9   :  { %v281_v15 = vadd.f32 %v817_v2, %v280_v58 }
 0x100   :  { %794 = vmatmul.msk.f32.gmra.mxu3 %vm64_vm0, %v304_v1  ;;  %v283_v59 = vpop.f32.mrf.mxu2 }
 0x108   :  { %795 = vmatmul.msk.f32.gmra.mxu3 %vm64_vm0, %v305_v7  ;;  %v286_v63 = vpop.f32.mrf.mxu2 }
 0x109   :  { %v287_v6 = vadd.f32 %v817_v2, %v286_v63 }
 0x10b   :  { %v322_v13 = vmul.f32 %v314_v9, %v287_v6 }
 0x110   :  { %796 = vmatmul.msk.f32.gmra.mxu3 %vm64_vm0, %v306_v11  ;;  %v289_v7 = vpop.f32.mrf.mxu2 }
 0x111   :  { %v290_v10 = vadd.f32 %v817_v2, %v289_v7 }
 0x113   :  { %v323_v12 = vmul.f32 %v315_v8, %v290_v10 }
 0x115   :  { %662 = vmatpush.msrb.mxu0 %v323_v12 }
 0x117   :  { %663 = vmatpush.msrb.mxu0 %v322_v13 }
 0x118   :  { %797 = vmatmul.msk.f32.gmra.mxu3 %vm64_vm0, %v307_v16  ;;  %v284_v16 = vadd.f32 %v817_v2, %v283_v59 }
 0x163   :  { %v389_v23 = vpop.f32.mrf.mxu3 }
 0x164   :  { %v429_v24 = vsel %vm421_vm1, %v389_v23, %v413_v21  ;;  %v313_v21 = vld [vmem:[%s1291_s5 + $0x28] sm:$0xff]  ;;  %v311_v23 = vld [vmem:[%s1291_s5 + $0x18] sm:$0xff] }
 0x165   :  { %v438_v25 = vsel %vm437_vm2, %v429_v24, -inf }
 0x166   :  { %439 = vmax.xlane.f32.xlu0 %v438_v25  ;;  %v321_v25 = vmul.f32 %v313_v21, %v284_v16 }
 0x168   :  { %664 = vmatpush.msrb.mxu0 %v321_v25 }
 0x16b   :  { %v392_v27 = vpop.f32.mrf.mxu3 }
 0x16c   :  { %v430_v28 = vsel %vm422_vm3, %v392_v27, %v414_v26  ;;  %v320_v26 = vmul.f32 %v312_v22, %v281_v15  ;;  %v310_v27 = vld [vmem:[%s1291_s5 + $0x10] sm:$0xff] }
 0x16d   :  { %v441_v29 = vsel %vm437_vm2, %v430_v28, -inf }
 0x16e   :  { %442 = vmax.xlane.f32.xlu0 %v441_v29  ;;  %v319_v29 = vmul.f32 %v311_v23, %v278_v19  ;;  %665 = vmatpush.msrb.mxu0 %v320_v26 }
 0x170   :  { %666 = vmatpush.msrb.mxu0 %v319_v29 }
 0x173   :  { %v395_v31 = vpop.f32.mrf.mxu3 }
 0x174   :  { %v1144_v32 = vsel %vm423_vm4, %v395_v31, %v415_v30  ;;  %v269_v31 = vadd.f32 %v817_v2, %v268_v54 }
 0x175   :  { %v444_v33 = vsel %vm437_vm2, %v1144_v32, -inf }
 0x176   :  { %445 = vmax.xlane.f32.xlu1 %v444_v33 }
 0x17b   :  { %v398_v35 = vpop.f32.mrf.mxu3 }
 0x17c   :  { %v1151_v36 = vsel %vm424_vm5, %v398_v35, %v416_v34 }
 0x17d   :  { %v447_v37 = vsel %vm437_vm2, %v1151_v36, -inf }
 0x17e   :  { %448 = vmax.xlane.f32.xlu1 %v447_v37 }
 0x183   :  { %v401_v39 = vpop.f32.mrf.mxu3 }
 0x184   :  { %v1158_v40 = vsel %vm425_vm6, %v401_v39, %v417_v38  ;;  %v309_v38 = vld [vmem:[%s1291_s5 + $0x8] sm:$0xff] }
 0x185   :  { %v450_v41 = vsel %vm437_vm2, %v1158_v40, -inf }
 0x186   :  { %451 = vmax.xlane.f32.xlu2 %v450_v41 }
 0x18b   :  { %v404_v43 = vpop.f32.mrf.mxu3 }
 0x18c   :  { %v1165_v44 = vsel %vm426_vm7, %v404_v43, %v418_v42 }
 0x18d   :  { %v453_v45 = vsel %vm437_vm2, %v1165_v44, -inf }
 0x18e   :  { %454 = vmax.xlane.f32.xlu2 %v453_v45 }
 0x193   :  { %v407_v47 = vpop.f32.mrf.mxu3 }
 0x194   :  { %v1172_v48 = vsel %vm427_vm8, %v407_v47, %v419_v46 }
 0x195   :  { %v456_v49 = vsel %vm437_vm2, %v1172_v48, -inf }
 0x196   :  { %457 = vmax.xlane.f32.xlu0 %v456_v49 }
 0x19b   :  { %v410_v51 = vpop.f32.mrf.mxu3 }
 0x19c   :  { %v1179_v52 = vsel %vm428_vm9, %v410_v51, %v420_v50 }
 0x19d   :  { %v459_v53 = vsel %vm437_vm2, %v1179_v52, -inf }
 0x19e   :  { %460 = vmax.xlane.f32.xlu2 %v459_v53 }
 0x1d9   :  { %v440_v60 = vpop.xlane.xlu0 %439 }
 0x1da   :  { %v462_v61 = vsub.f32 %v429_v24, %v440_v60  ;;  %v275_v24 = vadd.f32 %v817_v2, %v274_v56 }
 0x1dc   :  { %v470_v62 = vmul.f32 1.442695, %v462_v61  ;;  %v318_v33 = vmul.f32 %v310_v27, %v275_v24 }
 0x1de   :  { %819 = vpow2.f32 %v470_v62  ;;  %667 = vmatpush.msrb.mxu0 %v318_v33 }
 0x1e1   :  { %v443_v0 = vpop.xlane.xlu0 %442 }
 0x1e2   :  { %v463_v1 = vsub.f32 %v430_v28, %v443_v0 }
 0x1e4   :  { %v1186_v3 = vpop.eup %819  ;;  %v472_v4 = vmul.f32 1.442695, %v463_v1 }
 0x1e5   :  { %v486_v5 = vsel %vm437_vm2, %v1186_v3, 0.0 }
 0x1e6   :  { %821 = vpow2.f32 %v472_v4  ;;  %487 = vadd.xlane.f32.xlu1 %v486_v5 }
 0x1e9   :  { %v446_v11 = vpop.xlane.xlu1 %445 }
 0x1ea   :  { %v464_v14 = vsub.f32 %v1144_v32, %v446_v11  ;;  %v272_v32 = vadd.f32 %v817_v2, %v271_v55 }
 0x1ec   :  { %v1197_v17 = vpop.eup %821  ;;  %v474_v18 = vmul.f32 1.442695, %v464_v14  ;;  %v317_v39 = vmul.f32 %v309_v38, %v272_v32 }
 0x1ed   :  { %v489_v20 = vsel %vm437_vm2, %v1197_v17, 0.0 }
 0x1ee   :  { %823 = vpow2.f32 %v474_v18  ;;  %490 = vadd.xlane.f32.xlu0 %v489_v20  ;;  %668 = vmatpush.msrb.mxu0 %v317_v39 }
 0x1f1   :  { %v449_v28 = vpop.xlane.xlu1 %448 }
 0x1f2   :  { %v465_v30 = vsub.f32 %v1151_v36, %v449_v28  ;;  %v308_v36 = vld [vmem:[%s1291_s5] sm:$0xff] }
 0x1f3   :  { %v316_v41 = vmul.f32 %v308_v36, %v269_v31 }
 0x1f4   :  { %v1214_v34 = vpop.eup %823  ;;  %v476_v35 = vmul.f32 1.442695, %v465_v30 }
 0x1f5   :  { %v492_v37 = vsel %vm437_vm2, %v1214_v34, 0.0  ;;  %669 = vmatpush.msrb.mxu0 %v316_v41 }
 0x1f6   :  { %825 = vpow2.f32 %v476_v35  ;;  %493 = vadd.xlane.f32.xlu1 %v492_v37 }
 0x1f9   :  { %v452_v42 = vpop.xlane.xlu2 %451 }
 0x1fa   :  { %v466_v43 = vsub.f32 %v1158_v40, %v452_v42 }
 0x1fc   :  { %v1225_v45 = vpop.eup %825  ;;  %v478_v46 = vmul.f32 1.442695, %v466_v43 }
 0x1fd   :  { %v495_v47 = vsel %vm437_vm2, %v1225_v45, 0.0 }
 0x1fe   :  { %827 = vpow2.f32 %v478_v46  ;;  %496 = vadd.xlane.f32.xlu2 %v495_v47 }
 0x201   :  { %v455_v49 = vpop.xlane.xlu2 %454 }
 0x202   :  { %v467_v50 = vsub.f32 %v1165_v44, %v455_v49 }
 0x204   :  { %v1230_v51 = vpop.eup %827  ;;  %v480_v53 = vmul.f32 1.442695, %v467_v50 }
 0x205   :  { %v498_v54 = vsel %vm437_vm2, %v1230_v51, 0.0 }
 0x206   :  { %829 = vpow2.f32 %v480_v53  ;;  %499 = vadd.xlane.f32.xlu0 %v498_v54 }
 0x209   :  { %v458_v40 = vpop.xlane.xlu0 %457 }
 0x20a   :  { %v468_v55 = vsub.f32 %v1172_v48, %v458_v40 }
 0x20c   :  { %v1235_v56 = vpop.eup %829  ;;  %v482_v57 = vmul.f32 1.442695, %v468_v55 }
 0x20d   :  { %v501_v58 = vsel %vm437_vm2, %v1235_v56, 0.0 }
 0x20e   :  { %831 = vpow2.f32 %v482_v57  ;;  %502 = vadd.xlane.f32.xlu1 %v501_v58 }
 0x211   :  { %v461_v44 = vpop.xlane.xlu2 %460 }
 0x212   :  { %v469_v59 = vsub.f32 %v1179_v52, %v461_v44 }
 0x214   :  { %v1240_v60 = vpop.eup %831  ;;  %v484_v61 = vmul.f32 1.442695, %v469_v59 }
 0x215   :  { %v504_v62 = vsel %vm437_vm2, %v1240_v60, 0.0 }
 0x216   :  { %833 = vpow2.f32 %v484_v61  ;;  %505 = vadd.xlane.f32.xlu2 %v504_v62  ;;  %v704_v61 = vld [vmem:[%s1298_s12 + $0x18] sm:$0xff] }
 0x217   :  { %727 = vmatpush.msrb.mxu1 %v704_v61 }
 0x21c   :  { %v1244_v48 = vpop.eup %833 }
 0x21d   :  { %v507_v63 = vsel %vm437_vm2, %v1244_v48, 0.0 }
 0x21e   :  { %508 = vadd.xlane.f32.xlu0 %v507_v63 }
 0x259   :  { %v488_v0 = vpop.xlane.xlu1 %487 }
 0x25a   :  { %835 = vrcp.f32 %v488_v0  ;;  %v521_v5 = vand.u32 2147483648, %v488_v0  ;;  %v519_v7 = vand.u32 2147483647, %v488_v0  ;;  %vm515_vm11 = vweird.f32 %v488_v0 }
 0x25c   :  { %v522_v10 = vor.u32 1.1754944e-38, %v521_v5  ;;  %vm520_vm13 = vcmp.eq.f32.partialorder %v519_v7, 8.507059e+37 }
 0x260   :  { %v836_v1 = vpop.eup %835 }
 0x261   :  { %v511_v2 = vmul.f32 %v836_v1, %v488_v0  ;;  %v491_v4 = vpop.xlane.xlu0 %490  ;;  %vm516_vm10 = vweird.f32 %v836_v1 }
 0x262   :  { %837 = vrcp.f32 %v491_v4  ;;  %vm517_vm12 = vmor %vm515_vm11, %vm516_vm10  ;;  %v536_v18 = vand.u32 2147483648, %v491_v4  ;;  %v534_v20 = vand.u32 2147483647, %v491_v4  ;;  %vm530_vm15 = vweird.f32 %v491_v4 }
 0x263   :  { %v512_v52 = vsub.f32 1.0, %v511_v2 }
 0x264   :  { %v537_v23 = vor.u32 1.1754944e-38, %v536_v18  ;;  %vm535_vm3 = vcmp.eq.f32.partialorder %v534_v20, 8.507059e+37 }
 0x265   :  { %v513_v6 = vmul.f32 %v836_v1, %v512_v52 }
 0x267   :  { %v514_v8 = vadd.f32 %v836_v1, %v513_v6 }
 0x268   :  { %v838_v9 = vpop.eup %837 }
 0x269   :  { %v526_v11 = vmul.f32 %v838_v9, %v491_v4  ;;  %v494_v12 = vpop.xlane.xlu1 %493  ;;  %v518_v13 = vsel %vm517_vm12, %v836_v1, %v514_v8  ;;  %vm531_vm14 = vweird.f32 %v838_v9 }
 0x26a   :  { %839 = vrcp.f32 %v494_v12  ;;  %v523_v14 = vsel %vm520_vm13, %v522_v10, %v518_v13  ;;  %vm532_vm1 = vmor %vm530_vm15, %vm531_vm14  ;;  %v551_v29 = vand.u32 2147483648, %v494_v12  ;;  %v549_v31 = vand.u32 2147483647, %v494_v12 }
 0x26b   :  { %v527_v15 = vsub.f32 1.0, %v526_v11  ;;  %v524_v16 = vmul.f32 %v1186_v3, %v523_v14  ;;  %vm545_vm5 = vweird.f32 %v494_v12 }
 0x26c   :  { %v552_v35 = vor.u32 1.1754944e-38, %v551_v29  ;;  %vm550_vm7 = vcmp.eq.f32.partialorder %v549_v31, 8.507059e+37 }
 0x26d   :  { %v528_v19 = vmul.f32 %v838_v9, %v527_v15  ;;  %798 = vmatmul.msk.f32.vlgmr.msrb.gmra.mxu0 %vm437_vm2, %v524_v16 }
 0x26f   :  { %v529_v21 = vadd.f32 %v838_v9, %v528_v19 }
 0x270   :  { %v840_v22 = vpop.eup %839 }
 0x271   :  { %v541_v24 = vmul.f32 %v840_v22, %v494_v12  ;;  %v497_v25 = vpop.xlane.xlu2 %496  ;;  %v533_v26 = vsel %vm532_vm1, %v838_v9, %v529_v21  ;;  %vm546_vm4 = vweird.f32 %v840_v22 }
 0x272   :  { %841 = vrcp.f32 %v497_v25  ;;  %v538_v27 = vsel %vm535_vm3, %v537_v23, %v533_v26  ;;  %vm547_vm6 = vmor %vm545_vm5, %vm546_vm4  ;;  %v566_v43 = vand.u32 2147483648, %v497_v25  ;;  %v564_v46 = vand.u32 2147483647, %v497_v25 }
 0x273   :  { %v542_v28 = vsub.f32 1.0, %v541_v24  ;;  %v539_v3 = vmul.f32 %v1197_v17, %v538_v27  ;;  %vm560_vm9 = vweird.f32 %v497_v25 }
 0x274   :  { %v567_v50 = vor.u32 1.1754944e-38, %v566_v43  ;;  %vm565_vm11 = vcmp.eq.f32.partialorder %v564_v46, 8.507059e+37 }
 0x275   :  { %v543_v30 = vmul.f32 %v840_v22, %v542_v28  ;;  %799 = vmatmul.msk.f32.gmra.mxu0 %vm437_vm2, %v539_v3 }
 0x277   :  { %v544_v32 = vadd.f32 %v840_v22, %v543_v30 }
 0x278   :  { %v842_v33 = vpop.eup %841 }
 0x279   :  { %v556_v37 = vmul.f32 %v842_v33, %v497_v25  ;;  %v500_v38 = vpop.xlane.xlu0 %499  ;;  %v548_v36 = vsel %vm547_vm6, %v840_v22, %v544_v32  ;;  %vm561_vm8 = vweird.f32 %v842_v33 }
 0x27a   :  { %843 = vrcp.f32 %v500_v38  ;;  %v553_v39 = vsel %vm550_vm7, %v552_v35, %v548_v36  ;;  %vm562_vm10 = vmor %vm560_vm9, %vm561_vm8  ;;  %v581_v44 = vand.u32 2147483648, %v500_v38  ;;  %v579_v59 = vand.u32 2147483647, %v500_v38  ;;  %v701_v36 = vld [vmem:[%s1298_s12] sm:$0xff] }
 0x27b   :  { %v557_v41 = vsub.f32 1.0, %v556_v37  ;;  %v554_v17 = vmul.f32 %v1214_v34, %v553_v39  ;;  %vm575_vm13 = vweird.f32 %v500_v38  ;;  %v702_v37 = vld [vmem:[%s1298_s12 + $0x8] sm:$0xff] }
 0x27c   :  { %v582_v0 = vor.u32 1.1754944e-38, %v581_v44  ;;  %vm580_vm15 = vcmp.eq.f32.partialorder %v579_v59, 8.507059e+37 }
 0x27d   :  { %v558_v42 = vmul.f32 %v842_v33, %v557_v41  ;;  %800 = vmatmul.msk.f32.gmra.mxu0 %vm437_vm2, %v554_v17 }
 0x27f   :  { %v559_v47 = vadd.f32 %v842_v33, %v558_v42 }
 0x280   :  { %v844_v49 = vpop.eup %843 }
 0x281   :  { %v571_v53 = vmul.f32 %v844_v49, %v500_v38  ;;  %v503_v54 = vpop.xlane.xlu1 %502  ;;  %v563_v40 = vsel %vm562_vm10, %v842_v33, %v559_v47  ;;  %vm576_vm12 = vweird.f32 %v844_v49 }
 0x282   :  { %845 = vrcp.f32 %v503_v54  ;;  %v568_v57 = vsel %vm565_vm11, %v567_v50, %v563_v40  ;;  %vm577_vm14 = vmor %vm575_vm13, %vm576_vm12  ;;  %v596_v7 = vand.u32 2147483648, %v503_v54  ;;  %v594_v8 = vand.u32 2147483647, %v503_v54 }
 0x283   :  { %v572_v55 = vsub.f32 1.0, %v571_v53  ;;  %v569_v34 = vmul.f32 %v1225_v45, %v568_v57  ;;  %vm590_vm3 = vweird.f32 %v503_v54 }
 0x284   :  { %v597_v11 = vor.u32 1.1754944e-38, %v596_v7  ;;  %vm595_vm5 = vcmp.eq.f32.partialorder %v594_v8, 8.507059e+37 }
 0x285   :  { %v573_v58 = vmul.f32 %v844_v49, %v572_v55  ;;  %801 = vmatmul.msk.f32.gmra.mxu0 %vm437_vm2, %v569_v34  ;;  %v818_v55 = vld [vmem:[%s1299_s13] ss:$0 sm:$0xff] }
 0x287   :  { %v574_v62 = vadd.f32 %v844_v49, %v573_v58 }
 0x288   :  { %v846_v63 = vpop.eup %845 }
 0x289   :  { %v586_v1 = vmul.f32 %v846_v63, %v503_v54  ;;  %v506_v2 = vpop.xlane.xlu2 %505  ;;  %v578_v4 = vsel %vm577_vm14, %v844_v49, %v574_v62  ;;  %vm591_vm1 = vweird.f32 %v846_v63 }
 0x28a   :  { %847 = vrcp.f32 %v506_v2  ;;  %v583_v52 = vsel %vm580_vm15, %v582_v0, %v578_v4  ;;  %vm592_vm4 = vmor %vm590_vm3, %vm591_vm1  ;;  %v611_v18 = vand.u32 2147483648, %v506_v2  ;;  %v609_v20 = vand.u32 2147483647, %v506_v2 }
 0x28b   :  { %v587_v45 = vsub.f32 1.0, %v586_v1  ;;  %v584_v5 = vmul.f32 %v1230_v51, %v583_v52  ;;  %vm605_vm7 = vweird.f32 %v506_v2 }
 0x28c   :  { %v612_v23 = vor.u32 1.1754944e-38, %v611_v18  ;;  %vm610_vm9 = vcmp.eq.f32.partialorder %v609_v20, 8.507059e+37 }
 0x28d   :  { %v588_v6 = vmul.f32 %v846_v63, %v587_v45  ;;  %802 = vmatmul.msk.f32.gmra.mxu0 %vm437_vm2, %v584_v5 }
 0x28f   :  { %v589_v9 = vadd.f32 %v846_v63, %v588_v6 }
 0x290   :  { %v848_v10 = vpop.eup %847 }
 0x291   :  { %v601_v12 = vmul.f32 %v848_v10, %v506_v2  ;;  %v509_v13 = vpop.xlane.xlu0 %508  ;;  %v593_v14 = vsel %vm592_vm4, %v846_v63, %v589_v9  ;;  %vm606_vm6 = vweird.f32 %v848_v10 }
 0x292   :  { %849 = vrcp.f32 %v509_v13  ;;  %v598_v16 = vsel %vm595_vm5, %v597_v11, %v593_v14  ;;  %vm607_vm8 = vmor %vm605_vm7, %vm606_vm6  ;;  %v626_v3 = vand.u32 2147483648, %v509_v13  ;;  %vm620_vm11 = vweird.f32 %v509_v13 }
 0x293   :  { %v602_v15 = vsub.f32 1.0, %v601_v12  ;;  %v599_v51 = vmul.f32 %v1235_v56, %v598_v16  ;;  %v624_v56 = vand.u32 2147483647, %v509_v13 }
 0x294   :  { %v627_v31 = vor.u32 1.1754944e-38, %v626_v3 }
 0x295   :  { %v603_v19 = vmul.f32 %v848_v10, %v602_v15  ;;  %803 = vmatmul.msk.f32.gmra.mxu0 %vm437_vm2, %v599_v51  ;;  %vm625_vm13 = vcmp.eq.f32.partialorder %v624_v56, 8.507059e+37 }
 0x297   :  { %v604_v21 = vadd.f32 %v848_v10, %v603_v19 }
 0x298   :  { %v850_v22 = vpop.eup %849 }
 0x299   :  { %v616_v24 = vmul.f32 %v850_v22, %v509_v13  ;;  %v608_v25 = vsel %vm607_vm8, %v848_v10, %v604_v21  ;;  %vm621_vm10 = vweird.f32 %v850_v22 }
 0x29a   :  { %v613_v26 = vsel %vm610_vm9, %v612_v23, %v608_v25  ;;  %vm622_vm12 = vmor %vm620_vm11, %vm621_vm10 }
 0x29b   :  { %v617_v27 = vsub.f32 1.0, %v616_v24  ;;  %v614_v28 = vmul.f32 %v1240_v60, %v613_v26  ;;  %v703_v60 = vld [vmem:[%s1298_s12 + $0x10] sm:$0xff] }
 0x29c   :  { %728 = vmatpush.msrb.mxu1 %v703_v60 }
 0x29d   :  { %v618_v29 = vmul.f32 %v850_v22, %v617_v27  ;;  %804 = vmatmul.msk.f32.gmra.mxu0 %vm437_vm2, %v614_v28 }
 0x29e   :  { %729 = vmatpush.msrb.mxu1 %v702_v37 }
 0x29f   :  { %v619_v30 = vadd.f32 %v850_v22, %v618_v29 }
 0x2a0   :  { %730 = vmatpush.msrb.mxu1 %v701_v36 }
 0x2a1   :  { %v623_v32 = vsel %vm622_vm12, %v850_v22, %v619_v30 }
 0x2a2   :  { %v628_v33 = vsel %vm625_vm13, %v627_v31, %v623_v32 }
 0x2a3   :  { %v629_v35 = vmul.f32 %v1244_v48, %v628_v33 }
 0x2a5   :  { %805 = vmatmul.msk.f32.gmra.mxu0 %vm437_vm2, %v629_v35 }
 0x2ea   :  { %v671_v38 = vpop.f32.mrf.mxu0 }
 0x2f2   :  { %v674_v39 = vpop.f32.mrf.mxu0 }
 0x2fa   :  { %v677_v48 = vpop.f32.mrf.mxu0 }
 0x2fb   :  { %v695_v43 = vadd.f32 %v677_v48, %v671_v38 }
 0x302   :  { %v680_v41 = vpop.f32.mrf.mxu0 }
 0x303   :  { %v696_v50 = vadd.f32 %v680_v41, %v674_v39 }
 0x30a   :  { %v683_v17 = vpop.f32.mrf.mxu0 }
 0x30b   :  { %v697_v46 = vadd.f32 %v695_v43, %v683_v17 }
 0x312   :  { %v686_v42 = vpop.f32.mrf.mxu0 }
 0x313   :  { %v698_v53 = vadd.f32 %v696_v50, %v686_v42 }
 0x31a   :  { %v689_v47 = vpop.f32.mrf.mxu0 }
 0x31b   :  { %v699_v49 = vadd.f32 %v697_v46, %v689_v47 }
 0x31d   :  { %806 = vmatmul.msk.f32.vlgmr.msrb.gmra.mxu1 %vm64_vm0, %v699_v49 }
 0x322   :  { %v692_v54 = vpop.f32.mrf.mxu0 }
 0x323   :  { %v700_v40 = vadd.f32 %v698_v53, %v692_v54 }
 0x325   :  { %807 = vmatmul.msk.f32.gmra.mxu1 %vm64_vm0, %v700_v40 }
 0x39a   :  { %v732_v57 = vpop.f32.mrf.mxu1 }
 0x39b   :  { %v733_v34 = vadd.f32 %v818_v55, %v732_v57 }
 0x39d   :  { %738 = vst.msk [vmem:[#allocation2] sm:$0xff] %vm64_vm0, %v733_v34 }
 0x3a2   :  { %v735_v58 = vpop.f32.mrf.mxu1 }
 0x3a3   :  { %v736_v44 = vadd.f32 %v818_v55, %v735_v58 }
 0x3a5   :  { %739 = vst.msk [vmem:[#allocation2 + $0x8] sm:$0xff] %vm64_vm0, %v736_v44 }
 0x3a6   :  { %752 = dma.vmem_to_hbm [thread:$0]  %s745_s3, 256, %s747_s18, [#allocation3], %s878_s19, %s878_s19, %s879_s20  }
 0x3a7   :  { %875 = dma.done.wait [#allocation3], 256  }
 0x3a8   :  { %876 = vsyncadd [#allocation3], 4294967040 }
 0x3a9   :  { %757 = vsyncpa [#allocation3], 1 }

</bundles_post_ra>
